<compile_context>
chip_gen: v5e
topology: v5e:2x2
jax: 0.10.0
libtpu: 0.0.40
codegen_flags: <defaults>
</compile_context>

<pallas_src>
import math
import jax
import jax.numpy as jnp
from jax.experimental import pallas as pl
from jax.experimental.pallas import tpu as pltpu


# ----------------------------------------------------------------------------
# Pallas kernel: fused actor+critic MLP + diagonal-MVN log_prob
# Internal layout: activations are [features, TILE_B] (batch on the lane axis).
# ----------------------------------------------------------------------------
def actor_critic_eval_kernel(
    st_ref,            # [TILE_B, S]  f32 state tile (row-major, straight from HBM)
    act_ref,           # [TILE_B, A]  f32 action tile
    w1_ref, b1_ref,    # [128, S] cdt , [128, 1] ewt   fused layer 1 (actor|critic)
    w2_ref, b2_ref,    # [64, 128] cdt, [64, 1]  ewt   block-diag layer 2
    w3_ref, b3_ref,    # [8, 64]  cdt , [8, 1]   f32   block-diag layer 3 (rows padded to 8)
    nhiv_ref,          # [A, 1]  f32  = -0.5 / action_var
    const_ref,         # [1, 1]  f32  = -0.5*(sum log var + A*log(2*pi))
    out_ref,           # [2, TILE_B]  row 0 = log_prob, row 1 = state value
):
    cdt = w1_ref.dtype          # MXU operand dtype (bf16 or f32)
    ewt = b1_ref.dtype          # hidden-layer elementwise dtype (bf16 on v6e/v7x)
    A = nhiv_ref.shape[0]

    # Transpose the small row-major tiles in-kernel so batch lands on the lane
    # axis (keeps the output slab lane-dense; transposes ride the XLU slot).
    x = st_ref[...].T.astype(cdt)                                       # [S, B]
    aT = act_ref[...].T                                                 # [A, B] f32

    h = jnp.dot(w1_ref[...], x, preferred_element_type=jnp.float32)     # [128, B]
    h = jnp.tanh(h.astype(ewt) + b1_ref[...])
    h = jnp.dot(w2_ref[...], h.astype(cdt),
                preferred_element_type=jnp.float32)                     # [64, B]
    h = jnp.tanh(h.astype(ewt) + b2_ref[...])
    o = jnp.dot(w3_ref[...], h.astype(cdt),
                preferred_element_type=jnp.float32) + b3_ref[...]       # [8, B] f32

    mean = jnp.tanh(o[:A, :])                                           # [A, B] f32
    value = o[A:A + 1, :]                                               # [1, B] f32

    # MVN log-prob; diff / reciprocal math kept in f32 for accuracy.
    diff = aT - mean                                                    # [A, B]
    logp = const_ref[...] + jnp.sum(diff * diff * nhiv_ref[...],
                                    axis=0, keepdims=True)              # [1, B]

    out_ref[0:1, :] = logp
    out_ref[1:2, :] = value


# ----------------------------------------------------------------------------
# Chip / tiling helpers
# ----------------------------------------------------------------------------
def _bf16_elementwise_ok():
    """bf16 VPU/EUP exist on v6e/v7x; v5e and older widen bf16 elementwise."""
    try:
        kind = jax.devices()[0].device_kind.lower()
    except Exception:
        return False
    return any(tag in kind for tag in ("v6", "v7", "7x"))


def _choose_tile_b(B, max_tile=1024):
    """Batch tile: one tile for small B (block == full array, no (8,128) rule);
    otherwise >=2 tiles (v7x megacore) sized as a multiple of 256 (fills the
    256-wide MXU N dim on v6e/v7x), capped at 1024.  VMEM is never binding."""
    if B < 512:
        return B
    half = pl.cdiv(B, 2)
    return min(max_tile, pl.cdiv(half, 256) * 256)


# ----------------------------------------------------------------------------
# One-time parameter preparation (hoisted out of the per-call hot path).
# PyTorch Linear layout: weight [out, in], bias [out].
# ----------------------------------------------------------------------------
def prepare_params(params, action_var, *, use_bf16=True, elementwise_bf16=None):
    cdt = jnp.bfloat16 if use_bf16 else jnp.float32
    if elementwise_bf16 is None:
        elementwise_bf16 = use_bf16 and _bf16_elementwise_ok()
    ewt = jnp.bfloat16 if elementwise_bf16 else jnp.float32
    A = action_var.shape[0]

    def blockdiag(a, b):
        r1, c1 = a.shape
        r2, c2 = b.shape
        top = jnp.concatenate([a, jnp.zeros((r1, c2), a.dtype)], axis=1)
        bot = jnp.concatenate([jnp.zeros((r2, c1), b.dtype), b], axis=1)
        return jnp.concatenate([top, bot], axis=0)

    w1 = jnp.concatenate([params["aw1"], params["cw1"]], axis=0)      # [128, S]
    b1 = jnp.concatenate([params["ab1"], params["cb1"]])[:, None]     # [128, 1]
    w2 = blockdiag(params["aw2"], params["cw2"])                      # [64, 128]
    b2 = jnp.concatenate([params["ab2"], params["cb2"]])[:, None]     # [64, 1]
    w3 = blockdiag(params["aw3"], params["cw3"])                      # [A+1, 64]
    b3 = jnp.concatenate([params["ab3"], params["cb3"]])[:, None]     # [A+1, 1]

    # Pad layer-3 output rows up to a full 8-sublane tile (zeros -> harmless).
    pad3 = (-w3.shape[0]) % 8
    if pad3:
        w3 = jnp.concatenate([w3, jnp.zeros((pad3, w3.shape[1]), w3.dtype)], axis=0)
        b3 = jnp.concatenate([b3, jnp.zeros((pad3, 1), b3.dtype)], axis=0)

    log_2pi = math.log(2.0 * math.pi)
    sum_log_var = jnp.sum(jnp.log(action_var))
    logp_const = -0.5 * (sum_log_var + A * log_2pi)
    entropy = 0.5 * A * (1.0 + log_2pi) + 0.5 * sum_log_var

    return dict(
        w1=w1.astype(cdt), b1=b1.astype(ewt),
        w2=w2.astype(cdt), b2=b2.astype(ewt),
        w3=w3.astype(cdt), b3=b3.astype(jnp.float32),
        nh_inv_var=(-0.5 / action_var)[:, None].astype(jnp.float32),  # [A, 1]
        logp_const=jnp.asarray(logp_const, jnp.float32).reshape(1, 1),
        entropy=jnp.asarray(entropy, jnp.float32),
        cdt=cdt, ewt=ewt,
    )


# ----------------------------------------------------------------------------
# Wrapper: batch grid, lane-dense output, megacore-parallel batch axis.
# ----------------------------------------------------------------------------
def actor_critic_evaluate(state, action, prep, *, tile_b=None):
    """Returns (action_logprobs [B], state_value [B], dist_entropy [B]).

    NOTE: if B is padded up to nb*tile_b, the padded tail rows compute garbage
    logp/value on zero inputs; they are sliced off below — never read out[:, B:].
    """
    B, S = state.shape
    A = action.shape[1]
    if tile_b is None:
        tile_b = _choose_tile_b(B)
    nb = pl.cdiv(B, tile_b)
    b_pad = nb * tile_b

    state = state.astype(jnp.float32)
    action = action.astype(jnp.float32)
    if b_pad != B:
        state = jnp.pad(state, ((0, b_pad - B), (0, 0)))
        action = jnp.pad(action, ((0, b_pad - B), (0, 0)))

    def resident(arr):
        # Whole array with a constant block index: stays resident in VMEM
        # across grid steps (no re-DMA per batch tile).
        return pl.BlockSpec(arr.shape, lambda i: (0, 0))

    H1, H2, H3 = prep["w1"].shape[0], prep["w2"].shape[0], prep["w3"].shape[0]
    flops = 2 * (H1 * S + H2 * H1 + H3 * H2) * b_pad
    transcend = (H1 + H2 + A) * b_pad
    w_bytes = sum(int(prep[k].size) * prep[k].dtype.itemsize
                  for k in ("w1", "b1", "w2", "b2", "w3", "b3",
                            "nh_inv_var", "logp_const"))
    bytes_acc = 4 * b_pad * (S + A + 2) + w_bytes

    grid_spec = pltpu.PrefetchScalarGridSpec(
        num_scalar_prefetch=0,
        grid=(nb,),
        in_specs=[
            pl.BlockSpec((tile_b, S), lambda i: (i, 0)),   # state tile (row-major)
            pl.BlockSpec((tile_b, A), lambda i: (i, 0)),   # action tile (row-major)
            resident(prep["w1"]), resident(prep["b1"]),
            resident(prep["w2"]), resident(prep["b2"]),
            resident(prep["w3"]), resident(prep["b3"]),
            resident(prep["nh_inv_var"]), resident(prep["logp_const"]),
        ],
        out_specs=pl.BlockSpec((2, tile_b), lambda i: (0, i)),
    )

    out = pl.pallas_call(
        actor_critic_eval_kernel,
        out_shape=jax.ShapeDtypeStruct((2, b_pad), jnp.float32),
        grid_spec=grid_spec,
        compiler_params=pltpu.CompilerParams(
            # Batch tiles are independent -> shard across v7x's 2 TensorCores.
            dimension_semantics=("parallel",)),
        cost_estimate=pl.CostEstimate(
            flops=int(flops),
            transcendentals=int(transcend),
            bytes_accessed=int(bytes_acc)),
    )(state, action,
      prep["w1"], prep["b1"], prep["w2"], prep["b2"], prep["w3"], prep["b3"],
      prep["nh_inv_var"], prep["logp_const"])

    logp = out[0, :B]
    value = out[1, :B]
    entropy = jnp.broadcast_to(prep["entropy"], (B,))   # batch-constant, host-side
    return logp, value, entropy


# ----------------------------------------------------------------------------
# Deterministic parameter init (PyTorch Linear shapes: weight [out, in])
# ----------------------------------------------------------------------------
def init_params(key, state_dim, action_dim):
    ks = jax.random.split(key, 12)

    def lin(kw, kb, fan_in, fan_out):
        bound = 1.0 / math.sqrt(fan_in)
        w = jax.random.uniform(kw, (fan_out, fan_in), jnp.float32, -bound, bound)
        b = jax.random.uniform(kb, (fan_out,), jnp.float32, -bound, bound)
        return w, b

    p = {}
    p["aw1"], p["ab1"] = lin(ks[0], ks[1], state_dim, 64)
    p["aw2"], p["ab2"] = lin(ks[2], ks[3], 64, 32)
    p["aw3"], p["ab3"] = lin(ks[4], ks[5], 32, action_dim)
    p["cw1"], p["cb1"] = lin(ks[6], ks[7], state_dim, 64)
    p["cw2"], p["cb2"] = lin(ks[8], ks[9], 64, 32)
    p["cw3"], p["cb3"] = lin(ks[10], ks[11], 32, 1)
    return p


# ----------------------------------------------------------------------------
# Pure-JAX reference.  cdt/ewt mirror the kernel's matmul-operand and
# hidden-elementwise dtypes; leave both f32 for the exact PyTorch math.
# ----------------------------------------------------------------------------
def reference_evaluate(state, action, p, action_var, *,
                       cdt=jnp.float32, ewt=jnp.float32):
    def layer(x, w, b, edt):
        y = jnp.dot(x.astype(cdt), w.T.astype(cdt),
                    preferred_element_type=jnp.float32)
        return y.astype(edt) + b.astype(edt)

    h = jnp.tanh(layer(state, p["aw1"], p["ab1"], ewt))
    h = jnp.tanh(layer(h, p["aw2"], p["ab2"], ewt))
    mean = jnp.tanh(layer(h, p["aw3"], p["ab3"], jnp.float32))

    hc = jnp.tanh(layer(state, p["cw1"], p["cb1"], ewt))
    hc = jnp.tanh(layer(hc, p["cw2"], p["cb2"], ewt))
    value = layer(hc, p["cw3"], p["cb3"], jnp.float32)

    A = action_var.shape[-1]
    log_2pi = math.log(2.0 * math.pi)
    diff = action - mean.astype(jnp.float32)
    maha = jnp.sum(diff * diff / action_var, axis=-1)
    sum_log_var = jnp.sum(jnp.log(action_var))
    logp = -0.5 * (maha + sum_log_var + A * log_2pi)
    ent = jnp.full((state.shape[0],),
                   0.5 * A * (1.0 + log_2pi) + 0.5 * sum_log_var,
                   dtype=jnp.float32)
    return logp, jnp.squeeze(value, -1), ent


# ----------------------------------------------------------------------------
if __name__ == "__main__":
    USE_BF16 = True   # bf16 MXU operands / f32 accumulate; bf16 tanh only on v6e/v7x

    key = jax.random.PRNGKey(0)
    k_param, k_state, k_action = jax.random.split(key, 3)

    batch = 8
    state_dim = 16
    action_dim = 4
    action_std = 0.5

    params = init_params(k_param, state_dim, action_dim)
    action_var = jnp.full((action_dim,), action_std * action_std, jnp.float32)
    prep = prepare_params(params, action_var, use_bf16=USE_BF16)  # once, not per call

    state = jax.random.normal(k_state, (batch, state_dim), jnp.float32)
    action = jax.random.normal(k_action, (batch, action_dim), jnp.float32)

    logp, value, ent = actor_critic_evaluate(state, action, prep)
    jax.block_until_ready((logp, value, ent))

    # Check against a reference that mirrors the kernel's matmul/elementwise dtypes.
    r_logp, r_value, r_ent = reference_evaluate(
        state, action, params, action_var, cdt=prep["cdt"], ewt=prep["ewt"])
    assert jnp.allclose(logp, r_logp, atol=5e-2, rtol=5e-2), (logp, r_logp)
    assert jnp.allclose(value, r_value, atol=5e-2, rtol=5e-2), (value, r_value)
    assert jnp.allclose(ent, r_ent, atol=1e-5, rtol=1e-5), (ent, r_ent)

    # Loose sanity check against the exact f32 PyTorch-equivalent math.
    f_logp, f_value, f_ent = reference_evaluate(state, action, params, action_var)
    assert jnp.allclose(logp, f_logp, atol=1.0, rtol=0.2)
    assert jnp.allclose(value, f_value, atol=0.15, rtol=0.1)
    assert jnp.allclose(ent, f_ent, atol=1e-4)

    # TODO(synk): act()'s MVN sampling (dist.sample()) stays on the host via
    # jax.random; it is not part of the deterministic evaluate() hot path.
    print("KERNEL_OK")
</pallas_src>

<mosaic_0001>
module attributes {stable_mosaic.version = 11 : i64} {
  func.func @actor_critic_eval_kernel(%arg0: i32, %arg1: memref<8x16xf32, #tpu.memory_space<vmem>>, %arg2: memref<8x4xf32, #tpu.memory_space<vmem>>, %arg3: memref<128x16xbf16, #tpu.memory_space<vmem>>, %arg4: memref<128x1xf32, #tpu.memory_space<vmem>>, %arg5: memref<64x128xbf16, #tpu.memory_space<vmem>>, %arg6: memref<64x1xf32, #tpu.memory_space<vmem>>, %arg7: memref<8x64xbf16, #tpu.memory_space<vmem>>, %arg8: memref<8x1xf32, #tpu.memory_space<vmem>>, %arg9: memref<4x1xf32, #tpu.memory_space<vmem>>, %arg10: memref<1x1xf32, #tpu.memory_space<vmem>>, %arg11: memref<2x8xf32, #tpu.memory_space<vmem>>) attributes {dimension_semantics = [#tpu.dimension_semantics<parallel>], iteration_bounds = array<i64: 1>, scalar_prefetch = 0 : i64, scratch_operands = 0 : i64, tpu.core_type = #tpu.core_type<tc>, window_params = [{transform_indices = @transform_0, window_bounds = array<i64: 8, 16>}, {transform_indices = @transform_1, window_bounds = array<i64: 8, 4>}, {pipeline_mode = #tpu.pipeline_mode<synchronous>, transform_indices = @transform_2, window_bounds = array<i64: 128, 16>}, {pipeline_mode = #tpu.pipeline_mode<synchronous>, transform_indices = @transform_3, window_bounds = array<i64: 128, 1>}, {pipeline_mode = #tpu.pipeline_mode<synchronous>, transform_indices = @transform_4, window_bounds = array<i64: 64, 128>}, {pipeline_mode = #tpu.pipeline_mode<synchronous>, transform_indices = @transform_5, window_bounds = array<i64: 64, 1>}, {pipeline_mode = #tpu.pipeline_mode<synchronous>, transform_indices = @transform_6, window_bounds = array<i64: 8, 64>}, {pipeline_mode = #tpu.pipeline_mode<synchronous>, transform_indices = @transform_7, window_bounds = array<i64: 8, 1>}, {pipeline_mode = #tpu.pipeline_mode<synchronous>, transform_indices = @transform_8, window_bounds = array<i64: 4, 1>}, {pipeline_mode = #tpu.pipeline_mode<synchronous>, transform_indices = @transform_9, window_bounds = array<i64: 1, 1>}, {transform_indices = @transform_10, window_bounds = array<i64: 2, 8>}]} {
    %c0 = arith.constant 0 : index
    %c0_0 = arith.constant 0 : index
    %0 = vector.load %arg1[%c0, %c0_0] : memref<8x16xf32, #tpu.memory_space<vmem>>, vector<8x16xf32>
    %1 = tpu.transpose %0, [1, 0] : vector<8x16xf32> -> vector<16x8xf32>
    %2 = arith.truncf %1 : vector<16x8xf32> to vector<16x8xbf16>
    %c0_1 = arith.constant 0 : index
    %c0_2 = arith.constant 0 : index
    %3 = vector.load %arg2[%c0_1, %c0_2] : memref<8x4xf32, #tpu.memory_space<vmem>>, vector<8x4xf32>
    %4 = tpu.transpose %3, [1, 0] : vector<8x4xf32> -> vector<4x8xf32>
    %c0_3 = arith.constant 0 : index
    %c0_4 = arith.constant 0 : index
    %5 = vector.load %arg3[%c0_3, %c0_4] : memref<128x16xbf16, #tpu.memory_space<vmem>>, vector<128x16xbf16>
    %cst = arith.constant dense<0.000000e+00> : vector<128x8xf32>
    %6 = tpu.matmul %5, %2, %cst {dimension_numbers = #tpu.dot_dimension_numbers<[1], [0], [0], [1], [0, 0, 1, 1], [], []>} : vector<128x16xbf16>, vector<16x8xbf16>, vector<128x8xf32> -> vector<128x8xf32>
    %c0_5 = arith.constant 0 : index
    %c0_6 = arith.constant 0 : index
    %7 = vector.load %arg4[%c0_5, %c0_6] : memref<128x1xf32, #tpu.memory_space<vmem>>, vector<128x1xf32>
    %8 = vector.broadcast %7 : vector<128x1xf32> to vector<128x8xf32>
    %9 = arith.addf %6, %8 : vector<128x8xf32>
    %10 = math.tanh %9 : vector<128x8xf32>
    %c0_7 = arith.constant 0 : index
    %c0_8 = arith.constant 0 : index
    %11 = vector.load %arg5[%c0_7, %c0_8] : memref<64x128xbf16, #tpu.memory_space<vmem>>, vector<64x128xbf16>
    %12 = arith.truncf %10 : vector<128x8xf32> to vector<128x8xbf16>
    %cst_9 = arith.constant dense<0.000000e+00> : vector<64x8xf32>
    %13 = tpu.matmul %11, %12, %cst_9 {dimension_numbers = #tpu.dot_dimension_numbers<[1], [0], [0], [1], [0, 0, 1, 1], [], []>} : vector<64x128xbf16>, vector<128x8xbf16>, vector<64x8xf32> -> vector<64x8xf32>
    %c0_10 = arith.constant 0 : index
    %c0_11 = arith.constant 0 : index
    %14 = vector.load %arg6[%c0_10, %c0_11] : memref<64x1xf32, #tpu.memory_space<vmem>>, vector<64x1xf32>
    %15 = vector.broadcast %14 : vector<64x1xf32> to vector<64x8xf32>
    %16 = arith.addf %13, %15 : vector<64x8xf32>
    %17 = math.tanh %16 : vector<64x8xf32>
    %c0_12 = arith.constant 0 : index
    %c0_13 = arith.constant 0 : index
    %18 = vector.load %arg7[%c0_12, %c0_13] : memref<8x64xbf16, #tpu.memory_space<vmem>>, vector<8x64xbf16>
    %19 = arith.truncf %17 : vector<64x8xf32> to vector<64x8xbf16>
    %cst_14 = arith.constant dense<0.000000e+00> : vector<8x8xf32>
    %20 = tpu.matmul %18, %19, %cst_14 {dimension_numbers = #tpu.dot_dimension_numbers<[1], [0], [0], [1], [0, 0, 1, 1], [], []>} : vector<8x64xbf16>, vector<64x8xbf16>, vector<8x8xf32> -> vector<8x8xf32>
    %c0_15 = arith.constant 0 : index
    %c0_16 = arith.constant 0 : index
    %21 = vector.load %arg8[%c0_15, %c0_16] : memref<8x1xf32, #tpu.memory_space<vmem>>, vector<8x1xf32>
    %22 = vector.broadcast %21 : vector<8x1xf32> to vector<8x8xf32>
    %23 = arith.addf %20, %22 : vector<8x8xf32>
    %24 = vector.extract_strided_slice %23 {offsets = [0, 0], sizes = [4, 8], strides = [1, 1]} : vector<8x8xf32> to vector<4x8xf32>
    %25 = math.tanh %24 : vector<4x8xf32>
    %26 = vector.extract_strided_slice %23 {offsets = [4, 0], sizes = [1, 8], strides = [1, 1]} : vector<8x8xf32> to vector<1x8xf32>
    %27 = arith.subf %4, %25 : vector<4x8xf32>
    %c0_17 = arith.constant 0 : index
    %c0_18 = arith.constant 0 : index
    %28 = vector.load %arg10[%c0_17, %c0_18] : memref<1x1xf32, #tpu.memory_space<vmem>>, vector<1x1xf32>
    %29 = arith.mulf %27, %27 : vector<4x8xf32>
    %c0_19 = arith.constant 0 : index
    %c0_20 = arith.constant 0 : index
    %30 = vector.load %arg9[%c0_19, %c0_20] : memref<4x1xf32, #tpu.memory_space<vmem>>, vector<4x1xf32>
    %31 = vector.broadcast %30 : vector<4x1xf32> to vector<4x8xf32>
    %32 = arith.mulf %29, %31 : vector<4x8xf32>
    %cst_21 = arith.constant dense<0.000000e+00> : vector<8xf32>
    %33 = vector.multi_reduction <add>, %32, %cst_21 [0] : vector<4x8xf32> to vector<8xf32>
    %34 = vector.shape_cast %33 : vector<8xf32> to vector<1x8xf32>
    %35 = vector.broadcast %28 : vector<1x1xf32> to vector<1x8xf32>
    %36 = arith.addf %35, %34 : vector<1x8xf32>
    %c0_22 = arith.constant 0 : index
    %c0_23 = arith.constant 0 : index
    %37 = vector.load %arg11[%c0_22, %c0_23] : memref<2x8xf32, #tpu.memory_space<vmem>>, vector<1x8xf32>
    tpu.vector_store %arg11[%c0_22, %c0_23], %36 {strides = array<i32>} : memref<2x8xf32, #tpu.memory_space<vmem>>, vector<1x8xf32>,
    %c1 = arith.constant 1 : index
    %c0_24 = arith.constant 0 : index
    %38 = vector.load %arg11[%c1, %c0_24] : memref<2x8xf32, #tpu.memory_space<vmem>>, vector<1x8xf32>
    tpu.vector_store %arg11[%c1, %c0_24], %26 {strides = array<i32>} : memref<2x8xf32, #tpu.memory_space<vmem>>, vector<1x8xf32>,
    return
  }
  func.func @transform_0(%arg0: i32) -> (i32, i32) {
    %c0_i32 = arith.constant 0 : i32
    %c0_i32_0 = arith.constant 0 : i32
    return %arg0, %c0_i32 : i32, i32
  }
  func.func @transform_1(%arg0: i32) -> (i32, i32) {
    %c0_i32 = arith.constant 0 : i32
    %c0_i32_0 = arith.constant 0 : i32
    return %arg0, %c0_i32 : i32, i32
  }
  func.func @transform_2(%arg0: i32) -> (i32, i32) {
    %c0_i32 = arith.constant 0 : i32
    %c0_i32_0 = arith.constant 0 : i32
    %c0_i32_1 = arith.constant 0 : i32
    return %c0_i32, %c0_i32_0 : i32, i32
  }
  func.func @transform_3(%arg0: i32) -> (i32, i32) {
    %c0_i32 = arith.constant 0 : i32
    %c0_i32_0 = arith.constant 0 : i32
    %c0_i32_1 = arith.constant 0 : i32
    return %c0_i32, %c0_i32_0 : i32, i32
  }
  func.func @transform_4(%arg0: i32) -> (i32, i32) {
    %c0_i32 = arith.constant 0 : i32
    %c0_i32_0 = arith.constant 0 : i32
    %c0_i32_1 = arith.constant 0 : i32
    return %c0_i32, %c0_i32_0 : i32, i32
  }
  func.func @transform_5(%arg0: i32) -> (i32, i32) {
    %c0_i32 = arith.constant 0 : i32
    %c0_i32_0 = arith.constant 0 : i32
    %c0_i32_1 = arith.constant 0 : i32
    return %c0_i32, %c0_i32_0 : i32, i32
  }
  func.func @transform_6(%arg0: i32) -> (i32, i32) {
    %c0_i32 = arith.constant 0 : i32
    %c0_i32_0 = arith.constant 0 : i32
    %c0_i32_1 = arith.constant 0 : i32
    return %c0_i32, %c0_i32_0 : i32, i32
  }
  func.func @transform_7(%arg0: i32) -> (i32, i32) {
    %c0_i32 = arith.constant 0 : i32
    %c0_i32_0 = arith.constant 0 : i32
    %c0_i32_1 = arith.constant 0 : i32
    return %c0_i32, %c0_i32_0 : i32, i32
  }
  func.func @transform_8(%arg0: i32) -> (i32, i32) {
    %c0_i32 = arith.constant 0 : i32
    %c0_i32_0 = arith.constant 0 : i32
    %c0_i32_1 = arith.constant 0 : i32
    return %c0_i32, %c0_i32_0 : i32, i32
  }
  func.func @transform_9(%arg0: i32) -> (i32, i32) {
    %c0_i32 = arith.constant 0 : i32
    %c0_i32_0 = arith.constant 0 : i32
    %c0_i32_1 = arith.constant 0 : i32
    return %c0_i32, %c0_i32_0 : i32, i32
  }
  func.func @transform_10(%arg0: i32) -> (i32, i32) {
    %c0_i32 = arith.constant 0 : i32
    %c0_i32_0 = arith.constant 0 : i32
    return %c0_i32, %arg0 : i32, i32
  }
}

</mosaic_0001>

<bundles_post_ra>
// kernel: tpu_custom_call.1
= control target key start
LH: loop header
LB: loop body
LE: loop exit
PB: predicated region body
PF: predicated region fallthrough
CT: control target
= control target key end

     0   :  { %s907_s0 = inlined_call_operand.vmem [shape: f32[8,16], index: 0, kind: input, shape index: {}]   ;;  %s908_s1 = inlined_call_operand.vmem [shape: f32[8,4], index: 1, kind: input, shape index: {}]   ;;  %s909_s2 = inlined_call_operand.vmem [shape: bf16[128,16], index: 2, kind: input, shape index: {}]   ;;  %s910_s3 = inlined_call_operand.vmem [shape: f32[128,1], index: 3, kind: input, shape index: {}]   ;;  %s911_s4 = inlined_call_operand.vmem [shape: bf16[64,128], index: 4, kind: input, shape index: {}]   ;;  %s912_s5 = inlined_call_operand.vmem [shape: f32[64,1], index: 5, kind: input, shape index: {}]   ;;  %s913_s6 = inlined_call_operand.vmem [shape: bf16[8,64], index: 6, kind: input, shape index: {}]   ;;  %s914_s7 = inlined_call_operand.vmem [shape: f32[8,1], index: 7, kind: input, shape index: {}]   ;;  %s915_s8 = inlined_call_operand.vmem [shape: f32[4,1], index: 8, kind: input, shape index: {}]   ;;  %s916_s9 = inlined_call_operand.<no memory space> [shape: f32[1,1], index: 9, kind: input, shape index: {}]   ;;  %s917_s10 = inlined_call_operand.hbm [shape: f32[2,8], index: 10, kind: output, shape index: {}]  }
   0x1   :  { %v15_v0 = vstv %s916_s9 }
   0x2   :  { %16 = vst [vmem:[#allocation2] sm:$0x1] %v15_v0 }
   0x3   :  { %v39_v1 = vld [vmem:[%s907_s0] sm:$0xff]  ;;  %v137_v2 = vld [vmem:[%s910_s3 + $0x78] sm:$0xff]  ;;  %v707_v3 = vmov 0   ;;  %v135_v4 = vld [vmem:[%s910_s3 + $0x68] sm:$0xff] }
   0x4   :  { %40 = vxpose.xlu0.b32.start.end [1/1] (short) (narrow) %v39_v1, 16  ;;  %629 = vset.pattern.permute.xlu1 %v707_v3 }
   0x5   :  { %215 = vperm.xlu1 %629, %v137_v2   ;;  %630 = vset.pattern.permute.xlu2 %v707_v3 }
   0x6   :  { %17 = vsyncpa [#allocation4], 0  ;;  %205 = vperm.xlu2 %630, %v135_v4   ;;  %v134_v5 = vld [vmem:[%s910_s3 + $0x60] sm:$0xff]  ;;  %v133_v6 = vld [vmem:[%s910_s3 + $0x58] sm:$0xff]  ;;  %vm258_vm0 = vcmask 130048   ;;  %vm484_vm1 = vcmask 523264  }
   0x7   :  { %v131_v7 = vld [vmem:[%s910_s3 + $0x48] sm:$0xff]  ;;  %v129_v8 = vld [vmem:[%s910_s3 + $0x38] sm:$0xff]  ;;  %v132_v9 = vld [vmem:[%s910_s3 + $0x50] sm:$0xff]  ;;  %vm529_vm2 = vcmask 61444   ;;  %vm512_vm3 = vcmask 60416   ;;  %s538_s24 = sshll.u32 %s917_s10, 4  ;;  %s539_s24 = int_to_ptr.hbm [resolvable:$true] %s538_s24 }
   0x8   :  { %v127_v10 = vld [vmem:[%s910_s3 + $0x28] sm:$0xff]  ;;  %v130_v11 = vld [vmem:[%s910_s3 + $0x40] sm:$0xff]  ;;  %v125_v12 = vld [vmem:[%s910_s3 + $0x18] sm:$0xff]  ;;  %vm527_vm4 = vcmask 57344  }
   0x9   :  { %v128_v13 = vld [vmem:[%s910_s3 + $0x30] sm:$0xff]  ;;  %v123_v14 = vld [vmem:[%s910_s3 + $0x8] sm:$0xff]  ;;  %v126_v15 = vld [vmem:[%s910_s3 + $0x20] sm:$0xff] }
   0xa   :  { %v371_v16 = vld [vmem:[%s912_s5 + $0x38] sm:$0xff]  ;;  %v124_v17 = vld [vmem:[%s910_s3 + $0x10] sm:$0xff]  ;;  %v369_v18 = vld [vmem:[%s912_s5 + $0x28] sm:$0xff] }
   0xb   :  { %v367_v20 = vld [vmem:[%s912_s5 + $0x18] sm:$0xff]  ;;  %v122_v21 = vld [vmem:[%s910_s3] sm:$0xff]  ;;  %v365_v26 = vld [vmem:[%s912_s5 + $0x8] sm:$0xff] }
   0xc   :  { %v604_v24 = vld [vmem:[%s909_s2] sm:$0xff]  ;;  %v370_v27 = vld [vmem:[%s912_s5 + $0x30] sm:$0xff]  ;;  %v605_v30 = vld [vmem:[%s909_s2 + $0x8] sm:$0xff] }
   0xd   :  { %200 = vperm.xlu1 %629, %v134_v5   ;;  %v608_v25 = vld [vmem:[%s909_s2 + $0x20] sm:$0xff]  ;;  %v609_v31 = vld [vmem:[%s909_s2 + $0x28] sm:$0xff]  ;;  %v136_v32 = vld [vmem:[%s910_s3 + $0x70] sm:$0xff] }
   0xe   :  { %190 = vperm.xlu2 %630, %v132_v9   ;;  %v505_v28 = vld [vmem:[%s915_s8] sm:$0xf]  ;;  %v366_v33 = vld [vmem:[%s912_s5 + $0x10] sm:$0xff]  ;;  %v607_v39 = vld [vmem:[%s909_s2 + $0x18] sm:$0xff] }
   0xf   :  { %v368_v29 = vld [vmem:[%s912_s5 + $0x20] sm:$0xff]  ;;  %v606_v35 = vld [vmem:[%s909_s2 + $0x10] sm:$0xff]  ;;  %v611_v40 = vld [vmem:[%s909_s2 + $0x38] sm:$0xff] }
  0x10   :  { %v364_v34 = vld [vmem:[%s912_s5] sm:$0xff]  ;;  %v610_v36 = vld [vmem:[%s909_s2 + $0x30] sm:$0xff] }
  0x11   :  { %v478_v37 = vld [vmem:[%s914_s7] sm:$0xff] }
  0x12   :  { %v503_v38 = vld [vmem:[#allocation2] sm:$0x1] }
  0x15   :  { %195 = vperm.xlu1 %629, %v133_v6  }
  0x16   :  { %180 = vperm.xlu2 %630, %v130_v11  }
  0x1d   :  { %185 = vperm.xlu1 %629, %v131_v7  }
  0x1e   :  { %170 = vperm.xlu2 %630, %v128_v13  }
  0x25   :  { %175 = vperm.xlu1 %629, %v129_v8  }
  0x26   :  { %160 = vperm.xlu2 %630, %v126_v15  }
  0x2d   :  { %165 = vperm.xlu1 %629, %v127_v10  }
  0x2e   :  { %150 = vperm.xlu2 %630, %v124_v17  }
  0x35   :  { %155 = vperm.xlu1 %629, %v125_v12  }
  0x36   :  { %140 = vperm.xlu2 %630, %v122_v21  }
  0x3d   :  { %145 = vperm.xlu1 %629, %v123_v14  }
  0x3e   :  { %404 = vperm.xlu2 %630, %v370_v27  }
  0x45   :  { %409 = vperm.xlu1 %629, %v371_v16  }
  0x46   :  { %394 = vperm.xlu2 %630, %v368_v29  }
  0x4d   :  { %399 = vperm.xlu1 %629, %v369_v18  }
  0x4e   :  { %384 = vperm.xlu2 %630, %v366_v33  }
  0x55   :  { %389 = vperm.xlu1 %629, %v367_v20  }
  0x56   :  { %374 = vperm.xlu2 %630, %v364_v34  }
  0x5d   :  { %379 = vperm.xlu1 %629, %v365_v26  }
  0x5e   :  { %481 = vperm.xlu2 %630, %v478_v37  }
  0x60   :  { %v206_v48 = vpop.permute.xlu2 %205 }
  0x65   :  { %508 = vperm.xlu1 %629, %v505_v28  }
  0x66   :  { %522 = vperm.xlu2 %630, %v503_v38  }
  0x68   :  { %v191_v52 = vpop.permute.xlu2 %190 }
  0x6b   :  { %628 = vset.pattern.permute.xlu0 %v707_v3 }
  0x70   :  { %v181_v56 = vpop.permute.xlu2 %180 }
  0x77   :  { %v216_v45 = vpop.permute.xlu1 %215 }
  0x78   :  { %v171_v61 = vpop.permute.xlu2 %170 }
  0x7a   :  { %210 = vperm.xlu0 %628, %v136_v32  }
  0x7f   :  { %v201_v49 = vpop.permute.xlu1 %200 }
  0x80   :  { %v161_v5 = vpop.permute.xlu2 %160 }
  0x87   :  { %v196_v53 = vpop.permute.xlu1 %195 }
  0x88   :  { %v151_v18 = vpop.permute.xlu2 %150 }
  0x8f   :  { %v186_v57 = vpop.permute.xlu1 %185 }
  0x90   :  { %v141_v34 = vpop.permute.xlu2 %140 }
  0x97   :  { %v176_v62 = vpop.permute.xlu1 %175 }
  0x9f   :  { %v166_v7 = vpop.permute.xlu1 %165 }
  0xa7   :  { %v156_v20 = vpop.permute.xlu1 %155 }
  0xa8   :  { %v56_v19 = vpop.trf.xlu0 }
  0xb0   :  { %v57_v22 = vpop.trf.xlu0 }
  0xb1   :  { %v72_v23 = vpack.c.bf16 %v57_v22, %v56_v19 }
  0xb3   :  { %290 = vmatpush.bf16.msra.mxu0 %v72_v23  ;;  %616 = vmatpush.bf16.msra.mxu3 %v72_v23 }
  0xb6   :  { %579 = vmatmul.msk.bf16.vlgmr.msra.gmra.mxu0 %vm258_vm0, %v604_v24  ;;  %583 = vmatmul.msk.bf16.vlgmr.msra.gmra.mxu3 %vm258_vm0, %v608_v25 }
  0xc6   :  { %580 = vmatmul.msk.bf16.gmra.mxu0 %vm258_vm0, %v605_v30  ;;  %584 = vmatmul.msk.bf16.gmra.mxu3 %vm258_vm0, %v609_v31 }
  0xd6   :  { %581 = vmatmul.msk.bf16.gmra.mxu0 %vm258_vm0, %v606_v35  ;;  %585 = vmatmul.msk.bf16.gmra.mxu3 %vm258_vm0, %v610_v36  ;;  %v146_v35 = vpop.permute.xlu1 %145 }
  0xe6   :  { %582 = vmatmul.msk.bf16.gmra.mxu0 %vm258_vm0, %v607_v39  ;;  %586 = vmatmul.msk.bf16.gmra.mxu3 %vm258_vm0, %v611_v40 }
  0xec   :  { %v211_v63 = vpop.permute.xlu0 %210 }
 0x133   :  { %v880_v41 = vpop.f32.mrf.mxu0 }
 0x134   :  { %v293_v36 = vadd.f32 %v880_v41, %v141_v34 }
 0x139   :  { %v312_v42 = vpop.f32.mrf.mxu3 }
 0x13a   :  { %v313_v16 = vadd.f32 %v312_v42, %v181_v56 }
 0x13b   :  { %v882_v43 = vpop.f32.mrf.mxu0 }
 0x13c   :  { %v295_v38 = vadd.f32 %v882_v43, %v146_v35  ;;  %v612_v43 = vld [vmem:[%s911_s4] sm:$0xff] }
 0x141   :  { %v314_v44 = vpop.f32.mrf.mxu3 }
 0x142   :  { %v315_v12 = vadd.f32 %v314_v44, %v186_v57  ;;  %v405_v57 = vpop.permute.xlu2 %404 }
 0x143   :  { %v297_v46 = vpop.f32.mrf.mxu0 }
 0x144   :  { %v298_v29 = vadd.f32 %v297_v46, %v151_v18 }
 0x149   :  { %v317_v47 = vpop.f32.mrf.mxu3 }
 0x14a   :  { %v318_v9 = vadd.f32 %v317_v47, %v191_v52  ;;  %v614_v52 = vld [vmem:[%s911_s4 + $0x10] sm:$0xff] }
 0x14b   :  { %v299_v51 = vpop.f32.mrf.mxu0 }
 0x14c   :  { %v300_v31 = vadd.f32 %v299_v51, %v156_v20  ;;  %v613_v51 = vld [vmem:[%s911_s4 + $0x8] sm:$0xff] }
 0x151   :  { %v319_v50 = vpop.f32.mrf.mxu3 }
 0x152   :  { %v320_v8 = vadd.f32 %v319_v50, %v196_v53  ;;  %v615_v50 = vld [vmem:[%s911_s4 + $0x18] sm:$0xff] }
 0x153   :  { %v302_v55 = vpop.f32.mrf.mxu0 }
 0x154   :  { %v303_v24 = vadd.f32 %v302_v55, %v161_v5 }
 0x159   :  { %v322_v54 = vpop.f32.mrf.mxu3 }
 0x15a   :  { %v323_v6 = vadd.f32 %v322_v54, %v201_v49  ;;  %v73_v54 = vld [vmem:[%s908_s1] sm:$0xff] }
 0x15b   :  { %v304_v59 = vpop.f32.mrf.mxu0  ;;  %74 = vxpose.xlu1.b32.start.end [1/1] (short) (narrow) %v73_v54, 8 }
 0x15c   :  { %v305_v26 = vadd.f32 %v304_v59, %v166_v7  ;;  %v410_v59 = vpop.permute.xlu1 %409 }
 0x161   :  { %v324_v58 = vpop.f32.mrf.mxu3 }
 0x162   :  { %v325_v3 = vadd.f32 %v324_v58, %v206_v48 }
 0x163   :  { %v307_v1 = vpop.f32.mrf.mxu0 }
 0x164   :  { %v308_v23 = vadd.f32 %v307_v1, %v171_v61  ;;  %v400_v1 = vpop.permute.xlu1 %399 }
 0x169   :  { %v327_v60 = vpop.f32.mrf.mxu3 }
 0x16a   :  { %v328_v0 = vadd.f32 %v327_v60, %v211_v63 }
 0x16b   :  { %v309_v13 = vpop.f32.mrf.mxu0 }
 0x16c   :  { %631 = vtanh.f32 %v328_v0  ;;  %v310_v19 = vadd.f32 %v309_v13, %v176_v62 }
 0x171   :  { %v329_v2 = vpop.f32.mrf.mxu3 }
 0x172   :  { %v330_v4 = vadd.f32 %v329_v2, %v216_v45  ;;  %v632_v10 = vpop.eup %631 }
 0x174   :  { %633 = vtanh.f32 %v330_v4  ;;  %v395_v4 = vpop.permute.xlu2 %394 }
 0x175   :  { %635 = vtanh.f32 %v325_v3 }
 0x176   :  { %637 = vtanh.f32 %v323_v6  ;;  %v390_v6 = vpop.permute.xlu1 %389 }
 0x177   :  { %639 = vtanh.f32 %v320_v8 }
 0x178   :  { %641 = vtanh.f32 %v318_v9 }
 0x179   :  { %643 = vtanh.f32 %v315_v12 }
 0x17a   :  { %v634_v11 = vpop.eup %633  ;;  %645 = vtanh.f32 %v313_v16 }
 0x17b   :  { %v363_v14 = vpack.c.bf16 %v634_v11, %v632_v10  ;;  %v636_v15 = vpop.eup %635  ;;  %647 = vtanh.f32 %v310_v19 }
 0x17c   :  { %v638_v17 = vpop.eup %637  ;;  %649 = vtanh.f32 %v308_v23  ;;  %v385_v7 = vpop.permute.xlu2 %384 }
 0x17d   :  { %436 = vmatpush.bf16.msra.mxu1 %v363_v14  ;;  %617 = vmatpush.bf16.msra.mxu2 %v363_v14  ;;  %v362_v21 = vpack.c.bf16 %v636_v15, %v638_v17  ;;  %v640_v22 = vpop.eup %639  ;;  %651 = vtanh.f32 %v303_v24 }
 0x17e   :  { %v642_v25 = vpop.eup %641  ;;  %653 = vtanh.f32 %v305_v26  ;;  %v380_v13 = vpop.permute.xlu1 %379  ;;  %v473_v26 = vld [vmem:[%s913_s6] sm:$0xf]  ;;  %s708_s6 = smov [#allocation3]  }
 0x17f   :  { %v361_v27 = vpack.c.bf16 %v640_v22, %v642_v25  ;;  %v644_v28 = vpop.eup %643  ;;  %655 = vtanh.f32 %v298_v29  ;;  %s536_s22 = sshll.u32 %s708_s6, 4  ;;  %s537_s22 = int_to_ptr.vmem [resolvable:$true] %s536_s22 }
 0x180   :  { %v646_v30 = vpop.eup %645  ;;  %657 = vtanh.f32 %v300_v31 }
 0x181   :  { %437 = vmatpush.bf16.msra.mxu1 %v362_v21  ;;  %618 = vmatpush.bf16.msra.mxu2 %v362_v21  ;;  %v360_v32 = vpack.c.bf16 %v644_v28, %v646_v30  ;;  %v648_v33 = vpop.eup %647  ;;  %659 = vtanh.f32 %v293_v36 }
 0x182   :  { %v650_v37 = vpop.eup %649  ;;  %661 = vtanh.f32 %v295_v38 }
 0x183   :  { %v652_v39 = vpop.eup %651  ;;  %v359_v40 = vpack.c.bf16 %v648_v33, %v650_v37 }
 0x184   :  { %v654_v42 = vpop.eup %653  ;;  %v375_v15 = vpop.permute.xlu2 %374 }
 0x185   :  { %438 = vmatpush.bf16.msra.mxu1 %v361_v27  ;;  %619 = vmatpush.bf16.msra.mxu2 %v361_v27  ;;  %v656_v44 = vpop.eup %655  ;;  %v358_v45 = vpack.c.bf16 %v654_v42, %v652_v39 }
 0x186   :  { %v658_v46 = vpop.eup %657  ;;  %v509_v27 = vpop.permute.xlu1 %508 }
 0x187   :  { %v660_v41 = vpop.eup %659  ;;  %v357_v47 = vpack.c.bf16 %v658_v46, %v656_v44 }
 0x188   :  { %v662_v48 = vpop.eup %661 }
 0x189   :  { %439 = vmatpush.bf16.msra.mxu1 %v360_v32  ;;  %620 = vmatpush.bf16.msra.mxu2 %v360_v32  ;;  %v356_v49 = vpack.c.bf16 %v662_v48, %v660_v41 }
 0x18c   :  { %v482_v28 = vpop.permute.xlu2 %481 }
 0x18d   :  { %440 = vmatpush.bf16.msra.mxu1 %v359_v40  ;;  %621 = vmatpush.bf16.msra.mxu2 %v359_v40 }
 0x191   :  { %441 = vmatpush.bf16.msra.mxu1 %v358_v45  ;;  %622 = vmatpush.bf16.msra.mxu2 %v358_v45 }
 0x194   :  { %v523_v44 = vpop.permute.xlu2 %522 }
 0x195   :  { %442 = vmatpush.bf16.msra.mxu1 %v357_v47  ;;  %623 = vmatpush.bf16.msra.mxu2 %v357_v47  ;;  %v525_v46 = vperm.slane %v523_v44, 0 }
 0x199   :  { %443 = vmatpush.bf16.msra.mxu1 %v356_v49  ;;  %624 = vmatpush.bf16.msra.mxu2 %v356_v49 }
 0x19c   :  { %444 = vmatmul.bf16.vlgmr.msra.gmra.mxu1 %v612_v43  ;;  %459 = vmatmul.bf16.vlgmr.msra.gmra.mxu2 %v615_v50 }
 0x1ac   :  { %449 = vmatmul.bf16.gmra.mxu1 %v613_v51 }
 0x1bc   :  { %454 = vmatmul.bf16.gmra.mxu1 %v614_v52 }
 0x1ff   :  { %v90_v31 = vpop.trf.xlu1 }
 0x219   :  { %v445_v53 = vpop.f32.mrf.mxu1 }
 0x21a   :  { %v446_v16 = vadd.f32 %v445_v53, %v375_v15 }
 0x21f   :  { %v460_v55 = vpop.f32.mrf.mxu2 }
 0x220   :  { %v461_v58 = vadd.f32 %v460_v55, %v405_v57 }
 0x221   :  { %v447_v56 = vpop.f32.mrf.mxu1 }
 0x222   :  { %663 = vtanh.f32 %v461_v58  ;;  %v448_v14 = vadd.f32 %v447_v56, %v380_v13 }
 0x227   :  { %v462_v60 = vpop.f32.mrf.mxu2 }
 0x228   :  { %v463_v61 = vadd.f32 %v462_v60, %v410_v59  ;;  %v664_v63 = vpop.eup %663 }
 0x229   :  { %v450_v62 = vpop.f32.mrf.mxu1 }
 0x22a   :  { %665 = vtanh.f32 %v463_v61  ;;  %v451_v12 = vadd.f32 %v450_v62, %v385_v7 }
 0x230   :  { %v666_v0 = vpop.eup %665 }
 0x231   :  { %v452_v2 = vpop.f32.mrf.mxu1  ;;  %v477_v3 = vpack.c.bf16 %v666_v0, %v664_v63 }
 0x232   :  { %v453_v10 = vadd.f32 %v452_v2, %v390_v6 }
 0x233   :  { %492 = vmatpush.bf16.msrb.mxu2 %v477_v3 }
 0x239   :  { %v455_v5 = vpop.f32.mrf.mxu1 }
 0x23a   :  { %v456_v8 = vadd.f32 %v455_v5, %v395_v4 }
 0x23c   :  { %667 = vtanh.f32 %v456_v8 }
 0x241   :  { %v457_v9 = vpop.f32.mrf.mxu1 }
 0x242   :  { %v458_v11 = vadd.f32 %v457_v9, %v400_v1  ;;  %v668_v17 = vpop.eup %667 }
 0x244   :  { %669 = vtanh.f32 %v458_v11 }
 0x245   :  { %671 = vtanh.f32 %v453_v10 }
 0x246   :  { %673 = vtanh.f32 %v451_v12 }
 0x247   :  { %675 = vtanh.f32 %v448_v14 }
 0x248   :  { %677 = vtanh.f32 %v446_v16 }
 0x24a   :  { %v670_v18 = vpop.eup %669 }
 0x24b   :  { %v476_v19 = vpack.c.bf16 %v670_v18, %v668_v17  ;;  %v672_v20 = vpop.eup %671 }
 0x24c   :  { %v674_v21 = vpop.eup %673 }
 0x24d   :  { %493 = vmatpush.bf16.msrb.mxu2 %v476_v19  ;;  %v475_v22 = vpack.c.bf16 %v672_v20, %v674_v21  ;;  %v676_v23 = vpop.eup %675 }
 0x24e   :  { %v678_v24 = vpop.eup %677 }
 0x24f   :  { %v474_v25 = vpack.c.bf16 %v676_v23, %v678_v24 }
 0x251   :  { %494 = vmatpush.bf16.msrb.mxu2 %v475_v22 }
 0x255   :  { %495 = vmatpush.bf16.msrb.mxu2 %v474_v25 }
 0x258   :  { %603 = vmatmul.msk.bf16.vlgmr.msrb.gmra.mxu2 %vm484_vm1, %v473_v26 }
 0x2db   :  { %v497_v29 = vpop.f32.mrf.mxu2 }
 0x2dc   :  { %v498_v30 = vadd.f32 %v497_v29, %v482_v28 }
 0x2de   :  { %679 = vtanh.f32 %v498_v30  ;;  %530 = vst.msk [vmem:[#allocation3 - $0x3] sm:$0x10] %vm529_vm2, %v498_v30 }
 0x2e3   :  { %v499_v32 = vpop.f32.mrf.mxu2 }
 0x2e4   :  { %v680_v33 = vpop.eup %679 }
 0x2e5   :  { %v502_v34 = vsub.f32 %v90_v31, %v680_v33 }
 0x2e7   :  { %v504_v35 = vmul.f32 %v502_v34, %v502_v34 }
 0x2e9   :  { %v511_v36 = vmul.f32 %v509_v27, %v504_v35 }
 0x2eb   :  { %v513_v37 = vsel %vm512_vm3, %v511_v36, 0.0 }
 0x2ec   :  { %v514_v38 = vrot.slane %v513_v37, 4 }
 0x2ee   :  { %v515_v39 = vadd.f32 %v514_v38, %v513_v37 }
 0x2f0   :  { %v516_v40 = vrot.slane %v515_v39, 2 }
 0x2f2   :  { %v517_v42 = vadd.f32 %v516_v40, %v515_v39 }
 0x2f4   :  { %v518_v45 = vrot.slane %v517_v42, 1 }
 0x2f6   :  { %v519_v41 = vadd.f32 %v518_v45, %v517_v42 }
 0x2f8   :  { %v526_v47 = vadd.f32 %v525_v46, %v519_v41 }
 0x2fa   :  { %528 = vst.msk [vmem:[#allocation3] sm:$0x1] %vm527_vm4, %v526_v47 }
 0x2fb   :  { %541 = dma.vmem_to_hbm [thread:$0]  %s537_s22, 32, %s539_s24, [#allocation4]  }
 0x2fc   :  { %705 = dma.done.wait [#allocation4], 32  }
 0x2fd   :  { %706 = vsyncadd [#allocation4], 4294967264 }
 0x2fe   :  { %546 = vsyncpa [#allocation4], 1 }

</bundles_post_ra>
